<compile_context>
chip_gen: v6e
topology: v6e:2x2x1
jax: 0.10.0
libtpu: 0.0.40
codegen_flags: <defaults>
</compile_context>

<pallas_src>
import functools
import math

import jax
import jax.numpy as jnp
from jax.experimental import pallas as pl
from jax.experimental.pallas import tpu as pltpu


_BLOCK_BYTES = 8 * 1024 * 1024      # ~8 MiB blocks amortize per-step overhead
_MIN_SPLIT_BYTES = 1 * 1024 * 1024  # never shrink blocks below ~1 MiB just to lengthen grid
_TARGET_GRID = 8                    # aim for >= this many grid steps (megacore sharding)
_MAX_LANE = 4096                    # widest lane-dense last dim considered


def _round_up(n: int, m: int) -> int:
    return -(-n // m) * m


def _sublane_pack(itemsize: int) -> int:
    # f32 -> 8, bf16/f16 -> 16, int8/fp8 -> 32 sublane packing.
    return {1: 32, 2: 16}.get(itemsize, 8)


def _choose_block_rows(rows: int, lane: int, itemsize: int) -> int:
    pack = _sublane_pack(itemsize)
    row_bytes = lane * itemsize
    # Bytes-sized block (~8 MiB), aligned to the dtype's sublane pack.
    br = max(pack, (_BLOCK_BYTES // row_bytes) // pack * pack)
    # Keep several grid steps on mid-sized inputs so the "parallel" axis can
    # shard across v7x's two TensorCores; don't go below ~1 MiB per block.
    total_bytes = rows * row_bytes
    steps_target = min(_TARGET_GRID, max(1, total_bytes // _MIN_SPLIT_BYTES))
    if steps_target > 1:
        br = min(br, max(pack, _round_up(pl.cdiv(rows, steps_target), pack)))
    if br >= rows:
        return rows  # single block covering the full row dim (full-dim rule)
    return br        # multiple of the sublane pack; last block masked by Pallas


def _power_compressor_kernel(x_ref, o_ref, *, threshold: float, log_threshold: float):
    # Elementwise hot path: clamp -> log -> subtract log(threshold), in f32.
    x = x_ref[...].astype(jnp.float32)
    y = jnp.log(jnp.maximum(x, jnp.float32(threshold))) - jnp.float32(log_threshold)
    o_ref[...] = y.astype(o_ref.dtype)


def _compress_2d(x2d, *, threshold: float, donate: bool):
    rows, lane = x2d.shape
    dtype = x2d.dtype
    itemsize = jnp.dtype(dtype).itemsize
    block_rows = _choose_block_rows(rows, lane, itemsize)
    grid = (pl.cdiv(rows, block_rows),)   # last block overhangs -> Pallas masks it

    block_bytes = block_rows * lane * itemsize
    # Double-buffered in + out = 4x block, plus headroom; capped well under
    # v7x's 64 MiB physical VMEM.
    vmem_limit = min(48 << 20, max(16 << 20, 4 * block_bytes + (8 << 20)))

    kernel = functools.partial(
        _power_compressor_kernel,
        threshold=float(threshold),
        log_threshold=math.log(float(threshold)),
    )
    n = rows * lane
    return pl.pallas_call(
        kernel,
        out_shape=jax.ShapeDtypeStruct((rows, lane), dtype),
        grid_spec=pltpu.PrefetchScalarGridSpec(
            num_scalar_prefetch=0,
            grid=grid,
            in_specs=[pl.BlockSpec((block_rows, lane), lambda i: (i, 0))],
            out_specs=pl.BlockSpec((block_rows, lane), lambda i: (i, 0)),
        ),
        compiler_params=pltpu.CompilerParams(
            dimension_semantics=("parallel",),
            vmem_limit_bytes=vmem_limit,
        ),
        cost_estimate=pl.CostEstimate(
            flops=2 * n,
            transcendentals=n,
            bytes_accessed=2 * n * itemsize,
        ),
        # Optional buffer aliasing: only useful when the caller actually
        # donates the input; default off so XLA never inserts a defensive copy.
        input_output_aliases=({0: 0} if donate else {}),
    )(x2d)


def power_compressor(power_specgram, *, threshold: float = 1e-6, donate: bool = False):
    """Log-compress power spectrogram(s) (batch, num_filters, num_frames).

    Accepts a single array or a list of arrays (matching the PyTorch module).
    """
    if threshold <= 0:
        raise ValueError("threshold must be a positive value.")
    if isinstance(power_specgram, (list, tuple)):
        return [power_compressor(p, threshold=threshold, donate=donate)
                for p in power_specgram]

    x = power_specgram
    shape = x.shape
    n = int(math.prod(shape)) if shape else 1
    if n == 0:
        return x  # empty input: nothing to compute
    itemsize = jnp.dtype(x.dtype).itemsize
    pack = _sublane_pack(itemsize)

    pad = 0
    if n % 128 == 0:
        # Zero-copy lane-dense view: widest lane (multiple of 128) dividing n.
        lane = next(m * 128 for m in range(_MAX_LANE // 128, 0, -1)
                    if n % (m * 128) == 0)
        x2d = x.reshape(n // lane, lane)
    elif x.ndim >= 2 and pack * shape[-1] * itemsize <= _BLOCK_BYTES:
        # Zero-copy fallback: block over leading dims with the full last dim.
        # Stores may be lane-masked, but there are no extra HBM passes.
        x2d = x.reshape(n // shape[-1], shape[-1])
    else:
        # Last resort (degenerate shapes only): pad flat tail to a lane-dense
        # slab; costs one extra HBM pass for the pad and one for the slice.
        lane = 1024
        rows = pl.cdiv(n, lane)
        pad = rows * lane - n
        x2d = jnp.pad(x.reshape(-1), (0, pad), constant_values=1.0).reshape(rows, lane)

    y2d = _compress_2d(x2d, threshold=threshold, donate=donate and pad == 0)
    if pad:
        return y2d.reshape(-1)[:n].reshape(shape)
    return y2d.reshape(shape)


def power_compressor_ref(power_specgram: jax.Array, *, threshold: float = 1e-6) -> jax.Array:
    """Pure-JAX reference matching the PyTorch module."""
    thr = jnp.asarray(threshold, dtype=power_specgram.dtype)
    return jnp.log(jnp.maximum(power_specgram, thr)) - jnp.log(thr)


if __name__ == "__main__":
    key = jax.random.PRNGKey(0)
    threshold = 1e-6

    # (2, 16, 100): n = 3200 (multiple of 128) -> zero-copy lane-dense path.
    x = jax.random.uniform(key, (2, 16, 100), dtype=jnp.float32, minval=0.0, maxval=10.0)
    x = x.at[:, :2, :4].set(1e-9)  # below threshold -> clamped
    y = jax.block_until_ready(power_compressor(x, threshold=threshold))
    y_ref = power_compressor_ref(x, threshold=threshold)
    assert y.shape == x.shape and y.dtype == x.dtype
    assert jnp.allclose(y, y_ref, rtol=1e-5, atol=1e-5), "mismatch vs reference (3D input)"

    # (3, 40, 250): n = 30000 (NOT a multiple of 128) -> zero-copy (B*F, T) path.
    x_odd = jax.random.uniform(jax.random.PRNGKey(2), (3, 40, 250), dtype=jnp.float32,
                               minval=0.0, maxval=10.0)
    y_odd = jax.block_until_ready(power_compressor(x_odd, threshold=threshold))
    assert jnp.allclose(y_odd, power_compressor_ref(x_odd, threshold=threshold),
                        rtol=1e-5, atol=1e-5), "mismatch vs reference (non-128 shape)"

    # List-of-spectrograms input (matches the PyTorch module's list path).
    x2 = jax.random.uniform(jax.random.PRNGKey(1), (2, 16, 128), dtype=jnp.float32,
                            minval=0.0, maxval=10.0)
    ys = jax.block_until_ready(power_compressor([x, x2], threshold=threshold))
    assert jnp.allclose(ys[0], y_ref, rtol=1e-5, atol=1e-5), "mismatch vs reference (list[0])"
    assert jnp.allclose(ys[1], power_compressor_ref(x2, threshold=threshold),
                        rtol=1e-5, atol=1e-5), "mismatch vs reference (list[1])"

    # bf16 path (compute in f32, cast back); compare against an f32 reference
    # with a bf16-appropriate tolerance.
    x_bf = x2.astype(jnp.bfloat16)
    y_bf = jax.block_until_ready(power_compressor(x_bf, threshold=threshold))
    ref_bf = power_compressor_ref(x_bf.astype(jnp.float32), threshold=threshold)
    assert y_bf.dtype == jnp.bfloat16
    assert jnp.allclose(y_bf.astype(jnp.float32), ref_bf, rtol=2e-2, atol=2e-2), \
        "mismatch vs reference (bf16)"

    print("KERNEL_OK")
</pallas_src>

<mosaic_0001>
module attributes {stable_mosaic.version = 11 : i64} {
  func.func @_power_compressor_kernel(%arg0: i32, %arg1: memref<1x3200xf32, #tpu.memory_space<vmem>>, %arg2: memref<1x3200xf32, #tpu.memory_space<vmem>>) attributes {dimension_semantics = [#tpu.dimension_semantics<parallel>], iteration_bounds = array<i64: 1>, scalar_prefetch = 0 : i64, scratch_operands = 0 : i64, tpu.core_type = #tpu.core_type<tc>, window_params = [{transform_indices = @transform_0, window_bounds = array<i64: 1, 3200>}, {transform_indices = @transform_1, window_bounds = array<i64: 1, 3200>}]} {
    %c0 = arith.constant 0 : index
    %c0_0 = arith.constant 0 : index
    %0 = vector.load %arg1[%c0, %c0_0] : memref<1x3200xf32, #tpu.memory_space<vmem>>, vector<1x3200xf32>
    %cst = arith.constant 9.99999997E-7 : f32
    %1 = vector.broadcast %cst : f32 to vector<1x3200xf32>
    %2 = arith.maximumf %0, %1 : vector<1x3200xf32>
    %3 = math.log %2 : vector<1x3200xf32>
    %cst_1 = arith.constant -13.8155107 : f32
    %4 = vector.broadcast %cst_1 : f32 to vector<1x3200xf32>
    %5 = arith.subf %3, %4 : vector<1x3200xf32>
    %c0_2 = arith.constant 0 : index
    %c0_3 = arith.constant 0 : index
    %6 = vector.load %arg2[%c0_2, %c0_3] : memref<1x3200xf32, #tpu.memory_space<vmem>>, vector<1x3200xf32>
    tpu.vector_store %arg2[%c0_2, %c0_3], %5 {strides = array<i32>} : memref<1x3200xf32, #tpu.memory_space<vmem>>, vector<1x3200xf32>,
    return
  }
  func.func @transform_0(%arg0: i32) -> (i32, i32) {
    %c0_i32 = arith.constant 0 : i32
    %c0_i32_0 = arith.constant 0 : i32
    return %arg0, %c0_i32 : i32, i32
  }
  func.func @transform_1(%arg0: i32) -> (i32, i32) {
    %c0_i32 = arith.constant 0 : i32
    %c0_i32_0 = arith.constant 0 : i32
    return %arg0, %c0_i32 : i32, i32
  }
}

</mosaic_0001>

<bundles_post_ra>
// kernel: tpu_custom_call.1
= control target key start
LH: loop header
LB: loop body
LE: loop exit
PB: predicated region body
PF: predicated region fallthrough
CT: control target
= control target key end

     0   :  { %6 = vsyncpa [#allocation3], 0  ;;  %s140_s0 = inlined_call_operand.hbm [shape: f32[1,3200], index: 0, kind: input, shape index: {}]   ;;  %s141_s1 = inlined_call_operand.hbm [shape: f32[1,3200], index: 1, kind: output, shape index: {}]  }
   0x1   :  { %7 = vsyncpa [#allocation4], 0  ;;  %s122_s6 = smov [#allocation2]  }
   0x2   :  { %s14_s7 = sshll.u32 %s122_s6, 4  ;;  %s15_s7 = int_to_ptr.vmem [resolvable:$true] %s14_s7 }
   0x3   :  { %s86_s8 = scalar_lea.vmem %s15_s7, 400  ;;  %s90_s9 = scalar_lea.vmem %s15_s7, 416 }
   0x4   :  { %p87_p0 = scmp.ne.s32.totalorder %s15_s7, %s86_s8  ;;  %p91_p1 = scmp.lt.s32.totalorder %s15_s7, %s15_s7 }
   0x5   :  { %p92_p2 = scmp.lt.s32.totalorder %s90_s9, %s86_s8 }
   0x7   :  { %p93_p3 = por %p92_p2, %p91_p1 }
   0x9   :  { %p94_p4 = pnand %p93_p3, %p87_p0 }
   0xb   :  { %97 = shalt.err (!%p94_p4)
}
   0xc   :  { %17 = dma.hbm_to_vmem [thread:$0]  %s140_s0, 400, %s15_s7, [#allocation3]  }
   0xd   :  { %118 = dma.done.wait [#allocation3], 400  }
   0xe   :  { %119 = vsyncadd [#allocation3], 4294966896  ;;  %v21_v0 = vld [vmem:[#allocation2] sm:$0xff]  ;;  %v22_v1 = vld [vmem:[#allocation2 + $0x8] sm:$0xff]  ;;  %v44_v11 = vlaneseq  ;;  %s123_s0 = smov [#allocation5]  }
   0xf   :  { %v23_v2 = vld [vmem:[#allocation2 + $0x10] sm:$0xff]  ;;  %v25_v3 = vmax.f32 %v21_v0, 1e-06  ;;  %v26_v4 = vmax.f32 %v22_v1, 1e-06  ;;  %s55_s12 = sshll.u32 %s123_s0, 4  ;;  %s56_s12 = int_to_ptr.vmem [resolvable:$true] %s55_s12 }
  0x10   :  { %v27_v5 = vmax.f32 %v23_v2, 1e-06  ;;  %v24_v6 = vld [vmem:[#allocation2 + $0x18] sm:$0x1]  ;;  %vm46_vm0 = vcmp.lt.s32.totalorder %v44_v11, 128  ;;  %s98_s13 = scalar_lea.vmem %s56_s12, 400  ;;  %p103_p6 = scmp.lt.s32.totalorder %s56_s12, %s56_s12 }
  0x11   :  { %70 = vlog2.f32 %v25_v3  ;;  %v28_v7 = vmax.f32 %v24_v6, 1e-06  ;;  %p99_p5 = scmp.ne.s32.totalorder %s56_s12, %s98_s13  ;;  %s102_s14 = scalar_lea.vmem %s56_s12, 416 }
  0x12   :  { %72 = vlog2.f32 %v26_v4  ;;  %p104_p7 = scmp.lt.s32.totalorder %s102_s14, %s98_s13 }
  0x13   :  { %74 = vlog2.f32 %v27_v5 }
  0x14   :  { %76 = vlog2.f32 %v28_v7  ;;  %p105_p8 = por %p104_p7, %p103_p6 }
  0x16   :  { %p106_p9 = pnand %p105_p8, %p99_p5 }
  0x1e   :  { %v71_v8 = vpop.eup %70 }
  0x1f   :  { %v73_v9 = vpop.eup %72  ;;  %v30_v10 = vmul.f32 0.6931472, %v71_v8 }
  0x20   :  { %v75_v12 = vpop.eup %74  ;;  %v32_v13 = vmul.f32 0.6931472, %v73_v9 }
  0x21   :  { %v77_v14 = vpop.eup %76  ;;  %v64_v15 = vadd.f32 13.815511, %v30_v10  ;;  %v34_v16 = vmul.f32 0.6931472, %v75_v12 }
  0x22   :  { %v65_v17 = vadd.f32 13.815511, %v32_v13  ;;  %v36_v18 = vmul.f32 0.6931472, %v77_v14 }
  0x23   :  { %41 = vst [vmem:[#allocation5] sm:$0xff] %v64_v15  ;;  %v66_v19 = vadd.f32 13.815511, %v34_v16 }
  0x24   :  { %42 = vst [vmem:[#allocation5 + $0x8] sm:$0xff] %v65_v17  ;;  %v67_v20 = vadd.f32 13.815511, %v36_v18 }
  0x25   :  { %43 = vst [vmem:[#allocation5 + $0x10] sm:$0xff] %v66_v19 }
  0x26   :  { %48 = vst.msk [vmem:[#allocation5 + $0x18] sm:$0x1] %vm46_vm0, %v67_v20 }
  0x27   :  { %109 = shalt.err (!%p106_p9)
}
  0x28   :  { %58 = dma.vmem_to_hbm [thread:$0]  %s56_s12, 400, %s141_s1, [#allocation4]  }
  0x29   :  { %120 = dma.done.wait [#allocation4], 400  }
  0x2a   :  { %121 = vsyncadd [#allocation4], 4294966896 }
  0x2b   :  { %62 = vsyncpa [#allocation3], 1 }
  0x2c   :  { %63 = vsyncpa [#allocation4], 1 }

</bundles_post_ra>
